<compile_context>
chip_gen: v7x
topology: tpu7x:2x2x1
jax: 0.10.0
libtpu: 0.0.40
codegen_flags: <defaults>
</compile_context>

<pallas_src>
import functools

import jax
import jax.numpy as jnp
from jax import lax
from jax.experimental import pallas as pl
from jax.experimental.pallas import tpu as pltpu

EPS = 1e-5


# ---------------------------------------------------------------------------
# Fused kernel: whole bottleneck block for one batch image.
# ---------------------------------------------------------------------------
def _bottleneck_kernel(x_ref, w1_ref, b1_ref, w2_ref, b2_ref, w3_ref, b3_ref,
                       wd_ref, o_ref, p_ref, *, ho, wo, tap_offsets):
    m = ho * wo
    cm1 = w1_ref.shape[1]                       # s0*s0*C1 (space-to-depth chans)

    x2d = x_ref[0]                              # (m, s0*s0*C0)

    # conv1 (1x1) + bn1 + relu.  Block-diagonal weight preserves the
    # space-to-depth sub-pixel structure; bn1 scale folded into the columns.
    out1 = jnp.dot(x2d, w1_ref[...], preferred_element_type=jnp.float32)
    out1 = jnp.maximum(out1 + b1_ref[...], 0.0)             # (m, cm1)

    # Stage conv1's output in a zero-halo'd VMEM scratch (1-cell border).
    p_ref[...] = jnp.zeros_like(p_ref)
    p_ref[1:ho + 1, 1:wo + 1, :] = out1.reshape(ho, wo, cm1)

    # conv2 (3x3, stride s0) + bn2 + relu: 9 accumulated matmuls over shifted
    # unit-stride views of the halo'd buffer.  Each tap weight is non-zero
    # only in the sub-pixel block that tap reads; bn2 scale folded in.
    acc = None
    for t, (dh, dw) in enumerate(tap_offsets):
        tap = p_ref[dh:dh + ho, dw:dw + wo, :].reshape(m, cm1)
        contrib = jnp.dot(tap, w2_ref[t], preferred_element_type=jnp.float32)
        acc = contrib if acc is None else acc + contrib
    out2 = jnp.maximum(acc + b2_ref[...], 0.0)               # (m, C2)

    # conv3 (1x1) + bn3 (scale folded into weights).
    out3 = jnp.dot(out2, w3_ref[...], preferred_element_type=jnp.float32)
    out3 = out3 + b3_ref[...]                                # (m, C3)

    # Downsample shortcut (1x1, stride s0): the zero-padded weight selects the
    # (0,0) sub-pixel of every s0 x s0 cell -> plain matmul, no striding.
    res = jnp.dot(x2d, wd_ref[...], preferred_element_type=jnp.float32)

    o_ref[0] = jnp.maximum(out3 + res, 0.0)


def _fused_block(x_sd, w1_bd, b1, w2_taps, b2, w3, b3, wd_pad, *,
                 ho, wo, tap_offsets):
    n, m, cx = x_sd.shape
    c3 = w3.shape[1]
    cm1 = w1_bd.shape[1]
    kernel = functools.partial(_bottleneck_kernel, ho=ho, wo=wo,
                               tap_offsets=tap_offsets)
    return pl.pallas_call(
        kernel,
        out_shape=jax.ShapeDtypeStruct((n, m, c3), jnp.float32),
        grid=(n,),
        in_specs=[
            pl.BlockSpec((1, m, cx), lambda b: (b, 0, 0)),        # activations
            pl.BlockSpec(w1_bd.shape, lambda b: (0, 0)),          # conv1 weight
            pl.BlockSpec(b1.shape, lambda b: (0, 0)),             # bn1 bias
            pl.BlockSpec(w2_taps.shape, lambda b: (0, 0, 0)),     # 9 tap weights
            pl.BlockSpec(b2.shape, lambda b: (0, 0)),             # bn2 bias
            pl.BlockSpec(w3.shape, lambda b: (0, 0)),             # conv3 weight
            pl.BlockSpec(b3.shape, lambda b: (0, 0)),             # bn3 bias
            pl.BlockSpec(wd_pad.shape, lambda b: (0, 0)),         # shortcut weight
        ],
        out_specs=pl.BlockSpec((1, m, c3), lambda b: (b, 0, 0)),
        scratch_shapes=[pltpu.VMEM((ho + 2, wo + 2, cm1), jnp.float32)],
        compiler_params=pltpu.CompilerParams(
            dimension_semantics=("parallel",)),
    )(x_sd, w1_bd, b1, w2_taps, b2, w3, b3, wd_pad)


# ---------------------------------------------------------------------------
# Parameter helpers (PyTorch OIHW conv layout -> matmul layout, BN folding)
# ---------------------------------------------------------------------------
def _conv1x1_to_mat(w_oihw):                    # (Cout, Cin, 1, 1) -> (Cin, Cout)
    return jnp.transpose(w_oihw[:, :, 0, 0], (1, 0))


def _fold_bn(gamma, beta, mean, var):
    scale = gamma * lax.rsqrt(var + EPS)
    bias = beta - mean * scale
    return scale, bias


def _conv_init(key, cout, cin, kh, kw):
    fan_in = cin * kh * kw
    return jax.random.normal(key, (cout, cin, kh, kw), jnp.float32) * (2.0 / fan_in) ** 0.5


def _bn_init(key, c):
    k1, k2, k3, k4 = jax.random.split(key, 4)
    gamma = jax.random.uniform(k1, (c,), jnp.float32, 0.5, 1.5)
    beta = 0.1 * jax.random.normal(k2, (c,), jnp.float32)
    mean = 0.1 * jax.random.normal(k3, (c,), jnp.float32)
    var = jax.random.uniform(k4, (c,), jnp.float32, 0.5, 1.5)
    return gamma, beta, mean, var


# ---------------------------------------------------------------------------
# Full forward pass (wrapper = weight prep + one space-to-depth transpose;
# all hot compute runs inside the single fused Pallas kernel).
# ---------------------------------------------------------------------------
def base_rest_block_downsample(x_nchw, params, stride):
    s0, s1 = int(stride[0]), int(stride[1])
    # The residual add in the module only has matching shapes when stride[1]==1.
    assert s1 == 1, "BaseRestBlockDownsample requires stride[1] == 1"
    assert s0 in (1, 2), "kernel supports conv2/downsample stride 1 or 2"

    n, c0, h, w = x_nchw.shape
    assert h % s0 == 0 and w % s0 == 0, "spatial dims must be divisible by stride[0]"
    ho, wo = h // s0, w // s0
    s2 = s0 * s0

    # ---- fold eval-mode BN into conv weights / biases ---------------------
    sc1, bi1 = _fold_bn(*params["bn1"])
    sc2, bi2 = _fold_bn(*params["bn2"])
    sc3, bi3 = _fold_bn(*params["bn3"])

    w1m = _conv1x1_to_mat(params["w1"]) * sc1[None, :]           # (C0, C1)
    w3m = _conv1x1_to_mat(params["w3"]) * sc3[None, :]           # (C2, C3)
    wdm = _conv1x1_to_mat(params["wd"])                          # (C0, C3)
    c1 = w1m.shape[1]
    c2, c3 = w3m.shape

    # ---- space-to-depth view of the input (one cheap XLA transpose) -------
    # x[n, c, s0*i+ph, s0*j+pw] -> x_sd[n, i*wo + j, (ph*s0 + pw)*C0 + c]
    x_sd = x_nchw.astype(jnp.float32).reshape(n, c0, ho, s0, wo, s0)
    x_sd = jnp.transpose(x_sd, (0, 2, 4, 3, 5, 1)).reshape(n, ho * wo, s2 * c0)

    # conv1 acts independently on each sub-pixel -> block-diagonal weight.
    w1_bd = jnp.kron(jnp.eye(s2, dtype=jnp.float32), w1m)        # (s2*C0, s2*C1)
    b1 = jnp.tile(bi1, s2).reshape(1, s2 * c1)

    # conv2: per-tap weight (s2*C1, C2), non-zero only in the sub-pixel block
    # that tap reads; the kernel accumulates over 9 unit-stride shifted views
    # of the (pad = s0) halo'd conv1 output.
    w2_hwio = jnp.transpose(params["w2"], (2, 3, 1, 0)) * sc2    # (3,3,C1,C2)
    taps, tap_offsets = [], []
    for kh in range(3):
        for kw in range(3):
            dh, ph = (kh + s0 - 1) // s0, (kh + s0 - 1) % s0
            dw, pw = (kw + s0 - 1) // s0, (kw + s0 - 1) % s0
            blk = ph * s0 + pw
            wt = jnp.zeros((s2 * c1, c2), jnp.float32)
            wt = wt.at[blk * c1:(blk + 1) * c1, :].set(w2_hwio[kh, kw])
            taps.append(wt)
            tap_offsets.append((dh, dw))
    w2_taps = jnp.stack(taps, axis=0)                            # (9, s2*C1, C2)
    b2 = bi2.reshape(1, c2)
    b3 = bi3.reshape(1, c3)

    # Downsample shortcut only sees the (0,0) sub-pixel of every cell.
    wd_pad = jnp.zeros((s2 * c0, c3), jnp.float32).at[:c0, :].set(wdm)

    out = _fused_block(x_sd, w1_bd, b1, w2_taps, b2, w3m, b3, wd_pad,
                       ho=ho, wo=wo, tap_offsets=tuple(tap_offsets))
    out = out.reshape(n, ho, wo, c3)
    return jnp.transpose(out, (0, 3, 1, 2))                      # NHWC -> NCHW


# ---------------------------------------------------------------------------
# Pure-JAX reference (eval-mode BN) for correctness checking
# ---------------------------------------------------------------------------
def _ref_forward(x_nchw, params, stride):
    s0, s1 = int(stride[0]), int(stride[1])
    x = jnp.transpose(x_nchw, (0, 2, 3, 1)).astype(jnp.float32)

    def conv(inp, w_oihw, st, pad):
        return lax.conv_general_dilated(
            inp, jnp.transpose(w_oihw, (2, 3, 1, 0)),
            window_strides=(st, st), padding=((pad, pad), (pad, pad)),
            dimension_numbers=("NHWC", "HWIO", "NHWC"))

    def bn(inp, p):
        g, b, m, v = p
        return (inp - m) * (g * lax.rsqrt(v + EPS)) + b

    res = conv(x, params["wd"], s0, 0)
    o = jax.nn.relu(bn(conv(x, params["w1"], s1, 0), params["bn1"]))
    o = jax.nn.relu(bn(conv(o, params["w2"], s0, 1), params["bn2"]))
    o = bn(conv(o, params["w3"], s1, 0), params["bn3"])
    o = jax.nn.relu(o + res)
    return jnp.transpose(o, (0, 3, 1, 2))


if __name__ == "__main__":
    channels = (4, 4, 8, 16)      # (in, mid1, mid2, out)
    stride = (2, 1)               # stride[0] -> conv2/downsample, stride[1] -> conv1/conv3

    key = jax.random.PRNGKey(0)
    k = jax.random.split(key, 8)
    params = {
        "w1": _conv_init(k[0], channels[1], channels[0], 1, 1),
        "w2": _conv_init(k[1], channels[2], channels[1], 3, 3),
        "w3": _conv_init(k[2], channels[3], channels[2], 1, 1),
        "wd": _conv_init(k[3], channels[3], channels[0], 1, 1),
        "bn1": _bn_init(k[4], channels[1]),
        "bn2": _bn_init(k[5], channels[2]),
        "bn3": _bn_init(k[6], channels[3]),
    }
    x = jax.random.normal(k[7], (2, channels[0], 16, 16), jnp.float32)   # NCHW

    fwd = jax.jit(base_rest_block_downsample, static_argnames=("stride",))
    out = jax.block_until_ready(fwd(x, params, stride=stride))

    ref = _ref_forward(x, params, stride)
    assert out.shape == (2, channels[3], 8, 8), out.shape
    max_err = float(jnp.max(jnp.abs(out - ref)))
    assert jnp.allclose(out, ref, atol=1e-3, rtol=1e-3), max_err

    print("KERNEL_OK")
</pallas_src>

<mosaic_0001>
module attributes {stable_mosaic.version = 11 : i64} {
  func.func @_bottleneck_kernel(%arg0: i32, %arg1: memref<1x64x16xf32, #tpu.memory_space<vmem>>, %arg2: memref<16x16xf32, #tpu.memory_space<vmem>>, %arg3: memref<1x16xf32, #tpu.memory_space<vmem>>, %arg4: memref<9x16x8xf32, #tpu.memory_space<vmem>>, %arg5: memref<1x8xf32, #tpu.memory_space<vmem>>, %arg6: memref<8x16xf32, #tpu.memory_space<vmem>>, %arg7: memref<1x16xf32, #tpu.memory_space<vmem>>, %arg8: memref<16x16xf32, #tpu.memory_space<vmem>>, %arg9: memref<1x64x16xf32, #tpu.memory_space<vmem>>, %arg10: memref<10x10x16xf32, #tpu.memory_space<vmem>>) attributes {dimension_semantics = [#tpu.dimension_semantics<parallel>], iteration_bounds = array<i64: 2>, scalar_prefetch = 0 : i64, scratch_operands = 1 : i64, tpu.core_type = #tpu.core_type<tc>, window_params = [{transform_indices = @transform_0, window_bounds = array<i64: 1, 64, 16>}, {pipeline_mode = #tpu.pipeline_mode<synchronous>, transform_indices = @transform_1, window_bounds = array<i64: 16, 16>}, {pipeline_mode = #tpu.pipeline_mode<synchronous>, transform_indices = @transform_2, window_bounds = array<i64: 1, 16>}, {pipeline_mode = #tpu.pipeline_mode<synchronous>, transform_indices = @transform_3, window_bounds = array<i64: 9, 16, 8>}, {pipeline_mode = #tpu.pipeline_mode<synchronous>, transform_indices = @transform_4, window_bounds = array<i64: 1, 8>}, {pipeline_mode = #tpu.pipeline_mode<synchronous>, transform_indices = @transform_5, window_bounds = array<i64: 8, 16>}, {pipeline_mode = #tpu.pipeline_mode<synchronous>, transform_indices = @transform_6, window_bounds = array<i64: 1, 16>}, {pipeline_mode = #tpu.pipeline_mode<synchronous>, transform_indices = @transform_7, window_bounds = array<i64: 16, 16>}, {transform_indices = @transform_8, window_bounds = array<i64: 1, 64, 16>}]} {
    %c0 = arith.constant 0 : index
    %c0_0 = arith.constant 0 : index
    %c0_1 = arith.constant 0 : index
    %0 = vector.load %arg1[%c0, %c0_0, %c0_1] : memref<1x64x16xf32, #tpu.memory_space<vmem>>, vector<1x64x16xf32>
    %1 = vector.shape_cast %0 : vector<1x64x16xf32> to vector<64x16xf32>
    %c0_2 = arith.constant 0 : index
    %c0_3 = arith.constant 0 : index
    %2 = vector.load %arg2[%c0_2, %c0_3] : memref<16x16xf32, #tpu.memory_space<vmem>>, vector<16x16xf32>
    %cst = arith.constant dense<0.000000e+00> : vector<64x16xf32>
    %3 = tpu.matmul %1, %2, %cst {dimension_numbers = #tpu.dot_dimension_numbers<[1], [0], [0], [1], [0, 0, 1, 1], [], []>} : vector<64x16xf32>, vector<16x16xf32>, vector<64x16xf32> -> vector<64x16xf32>
    %c0_4 = arith.constant 0 : index
    %c0_5 = arith.constant 0 : index
    %4 = vector.load %arg3[%c0_4, %c0_5] : memref<1x16xf32, #tpu.memory_space<vmem>>, vector<1x16xf32>
    %5 = vector.broadcast %4 : vector<1x16xf32> to vector<64x16xf32>
    %6 = arith.addf %3, %5 : vector<64x16xf32>
    %cst_6 = arith.constant 0.000000e+00 : f32
    %7 = vector.broadcast %cst_6 : f32 to vector<64x16xf32>
    %8 = arith.maximumf %6, %7 : vector<64x16xf32>
    %cst_7 = arith.constant 0.000000e+00 : f32
    %9 = vector.broadcast %cst_7 : f32 to vector<10x10x16xf32>
    %c0_8 = arith.constant 0 : index
    %c0_9 = arith.constant 0 : index
    %c0_10 = arith.constant 0 : index
    %10 = vector.load %arg10[%c0_8, %c0_9, %c0_10] : memref<10x10x16xf32, #tpu.memory_space<vmem>>, vector<10x10x16xf32>
    tpu.vector_store %arg10[%c0_8, %c0_9, %c0_10], %9 {strides = array<i32>} : memref<10x10x16xf32, #tpu.memory_space<vmem>>, vector<10x10x16xf32>,
    %11 = vector.shape_cast %8 : vector<64x16xf32> to vector<8x8x16xf32>
    %c1 = arith.constant 1 : index
    %c1_11 = arith.constant 1 : index
    %c0_12 = arith.constant 0 : index
    %12 = vector.load %arg10[%c1, %c1_11, %c0_12] : memref<10x10x16xf32, #tpu.memory_space<vmem>>, vector<8x8x16xf32>
    tpu.vector_store %arg10[%c1, %c1_11, %c0_12], %11 {strides = array<i32>} : memref<10x10x16xf32, #tpu.memory_space<vmem>>, vector<8x8x16xf32>,
    %c0_13 = arith.constant 0 : index
    %c0_14 = arith.constant 0 : index
    %c0_15 = arith.constant 0 : index
    %13 = vector.load %arg10[%c0_13, %c0_14, %c0_15] : memref<10x10x16xf32, #tpu.memory_space<vmem>>, vector<8x8x16xf32>
    %14 = vector.shape_cast %13 : vector<8x8x16xf32> to vector<64x16xf32>
    %c0_16 = arith.constant 0 : index
    %c0_17 = arith.constant 0 : index
    %c0_18 = arith.constant 0 : index
    %15 = vector.load %arg4[%c0_16, %c0_17, %c0_18] : memref<9x16x8xf32, #tpu.memory_space<vmem>>, vector<1x16x8xf32>
    %16 = vector.shape_cast %15 : vector<1x16x8xf32> to vector<16x8xf32>
    %cst_19 = arith.constant dense<0.000000e+00> : vector<64x8xf32>
    %17 = tpu.matmul %14, %16, %cst_19 {dimension_numbers = #tpu.dot_dimension_numbers<[1], [0], [0], [1], [0, 0, 1, 1], [], []>} : vector<64x16xf32>, vector<16x8xf32>, vector<64x8xf32> -> vector<64x8xf32>
    %c0_20 = arith.constant 0 : index
    %c1_21 = arith.constant 1 : index
    %c0_22 = arith.constant 0 : index
    %18 = vector.load %arg10[%c0_20, %c1_21, %c0_22] : memref<10x10x16xf32, #tpu.memory_space<vmem>>, vector<8x8x16xf32>
    %19 = vector.shape_cast %18 : vector<8x8x16xf32> to vector<64x16xf32>
    %c1_23 = arith.constant 1 : index
    %c0_24 = arith.constant 0 : index
    %c0_25 = arith.constant 0 : index
    %20 = vector.load %arg4[%c1_23, %c0_24, %c0_25] : memref<9x16x8xf32, #tpu.memory_space<vmem>>, vector<1x16x8xf32>
    %21 = vector.shape_cast %20 : vector<1x16x8xf32> to vector<16x8xf32>
    %cst_26 = arith.constant dense<0.000000e+00> : vector<64x8xf32>
    %22 = tpu.matmul %19, %21, %cst_26 {dimension_numbers = #tpu.dot_dimension_numbers<[1], [0], [0], [1], [0, 0, 1, 1], [], []>} : vector<64x16xf32>, vector<16x8xf32>, vector<64x8xf32> -> vector<64x8xf32>
    %23 = arith.addf %17, %22 : vector<64x8xf32>
    %c0_27 = arith.constant 0 : index
    %c1_28 = arith.constant 1 : index
    %c0_29 = arith.constant 0 : index
    %24 = vector.load %arg10[%c0_27, %c1_28, %c0_29] : memref<10x10x16xf32, #tpu.memory_space<vmem>>, vector<8x8x16xf32>
    %25 = vector.shape_cast %24 : vector<8x8x16xf32> to vector<64x16xf32>
    %c2 = arith.constant 2 : index
    %c0_30 = arith.constant 0 : index
    %c0_31 = arith.constant 0 : index
    %26 = vector.load %arg4[%c2, %c0_30, %c0_31] : memref<9x16x8xf32, #tpu.memory_space<vmem>>, vector<1x16x8xf32>
    %27 = vector.shape_cast %26 : vector<1x16x8xf32> to vector<16x8xf32>
    %cst_32 = arith.constant dense<0.000000e+00> : vector<64x8xf32>
    %28 = tpu.matmul %25, %27, %cst_32 {dimension_numbers = #tpu.dot_dimension_numbers<[1], [0], [0], [1], [0, 0, 1, 1], [], []>} : vector<64x16xf32>, vector<16x8xf32>, vector<64x8xf32> -> vector<64x8xf32>
    %29 = arith.addf %23, %28 : vector<64x8xf32>
    %c1_33 = arith.constant 1 : index
    %c0_34 = arith.constant 0 : index
    %c0_35 = arith.constant 0 : index
    %30 = vector.load %arg10[%c1_33, %c0_34, %c0_35] : memref<10x10x16xf32, #tpu.memory_space<vmem>>, vector<8x8x16xf32>
    %31 = vector.shape_cast %30 : vector<8x8x16xf32> to vector<64x16xf32>
    %c3 = arith.constant 3 : index
    %c0_36 = arith.constant 0 : index
    %c0_37 = arith.constant 0 : index
    %32 = vector.load %arg4[%c3, %c0_36, %c0_37] : memref<9x16x8xf32, #tpu.memory_space<vmem>>, vector<1x16x8xf32>
    %33 = vector.shape_cast %32 : vector<1x16x8xf32> to vector<16x8xf32>
    %cst_38 = arith.constant dense<0.000000e+00> : vector<64x8xf32>
    %34 = tpu.matmul %31, %33, %cst_38 {dimension_numbers = #tpu.dot_dimension_numbers<[1], [0], [0], [1], [0, 0, 1, 1], [], []>} : vector<64x16xf32>, vector<16x8xf32>, vector<64x8xf32> -> vector<64x8xf32>
    %35 = arith.addf %29, %34 : vector<64x8xf32>
    %c1_39 = arith.constant 1 : index
    %c1_40 = arith.constant 1 : index
    %c0_41 = arith.constant 0 : index
    %36 = vector.load %arg10[%c1_39, %c1_40, %c0_41] : memref<10x10x16xf32, #tpu.memory_space<vmem>>, vector<8x8x16xf32>
    %37 = vector.shape_cast %36 : vector<8x8x16xf32> to vector<64x16xf32>
    %c4 = arith.constant 4 : index
    %c0_42 = arith.constant 0 : index
    %c0_43 = arith.constant 0 : index
    %38 = vector.load %arg4[%c4, %c0_42, %c0_43] : memref<9x16x8xf32, #tpu.memory_space<vmem>>, vector<1x16x8xf32>
    %39 = vector.shape_cast %38 : vector<1x16x8xf32> to vector<16x8xf32>
    %cst_44 = arith.constant dense<0.000000e+00> : vector<64x8xf32>
    %40 = tpu.matmul %37, %39, %cst_44 {dimension_numbers = #tpu.dot_dimension_numbers<[1], [0], [0], [1], [0, 0, 1, 1], [], []>} : vector<64x16xf32>, vector<16x8xf32>, vector<64x8xf32> -> vector<64x8xf32>
    %41 = arith.addf %35, %40 : vector<64x8xf32>
    %c1_45 = arith.constant 1 : index
    %c1_46 = arith.constant 1 : index
    %c0_47 = arith.constant 0 : index
    %42 = vector.load %arg10[%c1_45, %c1_46, %c0_47] : memref<10x10x16xf32, #tpu.memory_space<vmem>>, vector<8x8x16xf32>
    %43 = vector.shape_cast %42 : vector<8x8x16xf32> to vector<64x16xf32>
    %c5 = arith.constant 5 : index
    %c0_48 = arith.constant 0 : index
    %c0_49 = arith.constant 0 : index
    %44 = vector.load %arg4[%c5, %c0_48, %c0_49] : memref<9x16x8xf32, #tpu.memory_space<vmem>>, vector<1x16x8xf32>
    %45 = vector.shape_cast %44 : vector<1x16x8xf32> to vector<16x8xf32>
    %cst_50 = arith.constant dense<0.000000e+00> : vector<64x8xf32>
    %46 = tpu.matmul %43, %45, %cst_50 {dimension_numbers = #tpu.dot_dimension_numbers<[1], [0], [0], [1], [0, 0, 1, 1], [], []>} : vector<64x16xf32>, vector<16x8xf32>, vector<64x8xf32> -> vector<64x8xf32>
    %47 = arith.addf %41, %46 : vector<64x8xf32>
    %c1_51 = arith.constant 1 : index
    %c0_52 = arith.constant 0 : index
    %c0_53 = arith.constant 0 : index
    %48 = vector.load %arg10[%c1_51, %c0_52, %c0_53] : memref<10x10x16xf32, #tpu.memory_space<vmem>>, vector<8x8x16xf32>
    %49 = vector.shape_cast %48 : vector<8x8x16xf32> to vector<64x16xf32>
    %c6 = arith.constant 6 : index
    %c0_54 = arith.constant 0 : index
    %c0_55 = arith.constant 0 : index
    %50 = vector.load %arg4[%c6, %c0_54, %c0_55] : memref<9x16x8xf32, #tpu.memory_space<vmem>>, vector<1x16x8xf32>
    %51 = vector.shape_cast %50 : vector<1x16x8xf32> to vector<16x8xf32>
    %cst_56 = arith.constant dense<0.000000e+00> : vector<64x8xf32>
    %52 = tpu.matmul %49, %51, %cst_56 {dimension_numbers = #tpu.dot_dimension_numbers<[1], [0], [0], [1], [0, 0, 1, 1], [], []>} : vector<64x16xf32>, vector<16x8xf32>, vector<64x8xf32> -> vector<64x8xf32>
    %53 = arith.addf %47, %52 : vector<64x8xf32>
    %c1_57 = arith.constant 1 : index
    %c1_58 = arith.constant 1 : index
    %c0_59 = arith.constant 0 : index
    %54 = vector.load %arg10[%c1_57, %c1_58, %c0_59] : memref<10x10x16xf32, #tpu.memory_space<vmem>>, vector<8x8x16xf32>
    %55 = vector.shape_cast %54 : vector<8x8x16xf32> to vector<64x16xf32>
    %c7 = arith.constant 7 : index
    %c0_60 = arith.constant 0 : index
    %c0_61 = arith.constant 0 : index
    %56 = vector.load %arg4[%c7, %c0_60, %c0_61] : memref<9x16x8xf32, #tpu.memory_space<vmem>>, vector<1x16x8xf32>
    %57 = vector.shape_cast %56 : vector<1x16x8xf32> to vector<16x8xf32>
    %cst_62 = arith.constant dense<0.000000e+00> : vector<64x8xf32>
    %58 = tpu.matmul %55, %57, %cst_62 {dimension_numbers = #tpu.dot_dimension_numbers<[1], [0], [0], [1], [0, 0, 1, 1], [], []>} : vector<64x16xf32>, vector<16x8xf32>, vector<64x8xf32> -> vector<64x8xf32>
    %59 = arith.addf %53, %58 : vector<64x8xf32>
    %c1_63 = arith.constant 1 : index
    %c1_64 = arith.constant 1 : index
    %c0_65 = arith.constant 0 : index
    %60 = vector.load %arg10[%c1_63, %c1_64, %c0_65] : memref<10x10x16xf32, #tpu.memory_space<vmem>>, vector<8x8x16xf32>
    %61 = vector.shape_cast %60 : vector<8x8x16xf32> to vector<64x16xf32>
    %c8 = arith.constant 8 : index
    %c0_66 = arith.constant 0 : index
    %c0_67 = arith.constant 0 : index
    %62 = vector.load %arg4[%c8, %c0_66, %c0_67] : memref<9x16x8xf32, #tpu.memory_space<vmem>>, vector<1x16x8xf32>
    %63 = vector.shape_cast %62 : vector<1x16x8xf32> to vector<16x8xf32>
    %cst_68 = arith.constant dense<0.000000e+00> : vector<64x8xf32>
    %64 = tpu.matmul %61, %63, %cst_68 {dimension_numbers = #tpu.dot_dimension_numbers<[1], [0], [0], [1], [0, 0, 1, 1], [], []>} : vector<64x16xf32>, vector<16x8xf32>, vector<64x8xf32> -> vector<64x8xf32>
    %65 = arith.addf %59, %64 : vector<64x8xf32>
    %c0_69 = arith.constant 0 : index
    %c0_70 = arith.constant 0 : index
    %66 = vector.load %arg5[%c0_69, %c0_70] : memref<1x8xf32, #tpu.memory_space<vmem>>, vector<1x8xf32>
    %67 = vector.broadcast %66 : vector<1x8xf32> to vector<64x8xf32>
    %68 = arith.addf %65, %67 : vector<64x8xf32>
    %cst_71 = arith.constant 0.000000e+00 : f32
    %69 = vector.broadcast %cst_71 : f32 to vector<64x8xf32>
    %70 = arith.maximumf %68, %69 : vector<64x8xf32>
    %c0_72 = arith.constant 0 : index
    %c0_73 = arith.constant 0 : index
    %71 = vector.load %arg6[%c0_72, %c0_73] : memref<8x16xf32, #tpu.memory_space<vmem>>, vector<8x16xf32>
    %cst_74 = arith.constant dense<0.000000e+00> : vector<64x16xf32>
    %72 = tpu.matmul %70, %71, %cst_74 {dimension_numbers = #tpu.dot_dimension_numbers<[1], [0], [0], [1], [0, 0, 1, 1], [], []>} : vector<64x8xf32>, vector<8x16xf32>, vector<64x16xf32> -> vector<64x16xf32>
    %c0_75 = arith.constant 0 : index
    %c0_76 = arith.constant 0 : index
    %73 = vector.load %arg7[%c0_75, %c0_76] : memref<1x16xf32, #tpu.memory_space<vmem>>, vector<1x16xf32>
    %74 = vector.broadcast %73 : vector<1x16xf32> to vector<64x16xf32>
    %75 = arith.addf %72, %74 : vector<64x16xf32>
    %c0_77 = arith.constant 0 : index
    %c0_78 = arith.constant 0 : index
    %76 = vector.load %arg8[%c0_77, %c0_78] : memref<16x16xf32, #tpu.memory_space<vmem>>, vector<16x16xf32>
    %cst_79 = arith.constant dense<0.000000e+00> : vector<64x16xf32>
    %77 = tpu.matmul %1, %76, %cst_79 {dimension_numbers = #tpu.dot_dimension_numbers<[1], [0], [0], [1], [0, 0, 1, 1], [], []>} : vector<64x16xf32>, vector<16x16xf32>, vector<64x16xf32> -> vector<64x16xf32>
    %78 = arith.addf %75, %77 : vector<64x16xf32>
    %cst_80 = arith.constant 0.000000e+00 : f32
    %79 = vector.broadcast %cst_80 : f32 to vector<64x16xf32>
    %80 = arith.maximumf %78, %79 : vector<64x16xf32>
    %c0_81 = arith.constant 0 : index
    %c0_82 = arith.constant 0 : index
    %c0_83 = arith.constant 0 : index
    %81 = vector.load %arg9[%c0_81, %c0_82, %c0_83] : memref<1x64x16xf32, #tpu.memory_space<vmem>>, vector<1x64x16xf32>
    %82 = vector.shape_cast %81 : vector<1x64x16xf32> to vector<64x16xf32>
    %83 = vector.shape_cast %80 : vector<64x16xf32> to vector<1x64x16xf32>
    tpu.vector_store %arg9[%c0_81, %c0_82, %c0_83], %83 {strides = array<i32>} : memref<1x64x16xf32, #tpu.memory_space<vmem>>, vector<1x64x16xf32>,
    return
  }
  func.func @transform_0(%arg0: i32) -> (i32, i32, i32) {
    %c0_i32 = arith.constant 0 : i32
    %c0_i32_0 = arith.constant 0 : i32
    %c0_i32_1 = arith.constant 0 : i32
    return %arg0, %c0_i32, %c0_i32_0 : i32, i32, i32
  }
  func.func @transform_1(%arg0: i32) -> (i32, i32) {
    %c0_i32 = arith.constant 0 : i32
    %c0_i32_0 = arith.constant 0 : i32
    %c0_i32_1 = arith.constant 0 : i32
    return %c0_i32, %c0_i32_0 : i32, i32
  }
  func.func @transform_2(%arg0: i32) -> (i32, i32) {
    %c0_i32 = arith.constant 0 : i32
    %c0_i32_0 = arith.constant 0 : i32
    %c0_i32_1 = arith.constant 0 : i32
    return %c0_i32, %c0_i32_0 : i32, i32
  }
  func.func @transform_3(%arg0: i32) -> (i32, i32, i32) {
    %c0_i32 = arith.constant 0 : i32
    %c0_i32_0 = arith.constant 0 : i32
    %c0_i32_1 = arith.constant 0 : i32
    %c0_i32_2 = arith.constant 0 : i32
    return %c0_i32, %c0_i32_0, %c0_i32_1 : i32, i32, i32
  }
  func.func @transform_4(%arg0: i32) -> (i32, i32) {
    %c0_i32 = arith.constant 0 : i32
    %c0_i32_0 = arith.constant 0 : i32
    %c0_i32_1 = arith.constant 0 : i32
    return %c0_i32, %c0_i32_0 : i32, i32
  }
  func.func @transform_5(%arg0: i32) -> (i32, i32) {
    %c0_i32 = arith.constant 0 : i32
    %c0_i32_0 = arith.constant 0 : i32
    %c0_i32_1 = arith.constant 0 : i32
    return %c0_i32, %c0_i32_0 : i32, i32
  }
  func.func @transform_6(%arg0: i32) -> (i32, i32) {
    %c0_i32 = arith.constant 0 : i32
    %c0_i32_0 = arith.constant 0 : i32
    %c0_i32_1 = arith.constant 0 : i32
    return %c0_i32, %c0_i32_0 : i32, i32
  }
  func.func @transform_7(%arg0: i32) -> (i32, i32) {
    %c0_i32 = arith.constant 0 : i32
    %c0_i32_0 = arith.constant 0 : i32
    %c0_i32_1 = arith.constant 0 : i32
    return %c0_i32, %c0_i32_0 : i32, i32
  }
  func.func @transform_8(%arg0: i32) -> (i32, i32, i32) {
    %c0_i32 = arith.constant 0 : i32
    %c0_i32_0 = arith.constant 0 : i32
    %c0_i32_1 = arith.constant 0 : i32
    return %arg0, %c0_i32, %c0_i32_0 : i32, i32, i32
  }
}

</mosaic_0001>

<bundles_post_ra>
// kernel: tile.8
= control target key start
LH: loop header
LB: loop body
LE: loop exit
PB: predicated region body
PF: predicated region fallthrough
CT: control target
= control target key end

     0   :  { %s22_s0 = inlined_call_operand.vmem [shape: f32[4], index: 0, kind: input, shape index: {}]   ;;  %s23_s1 = inlined_call_operand.vmem [shape: f32[4,4], index: 1, kind: output, shape index: {}]  }
   0x1   :  { %v4_v0 = vld [vmem:[%s22_s0] ss:$0 sm:$0xff] }
   0x2   :  { %5 = vst [vmem:[%s23_s1] sm:$0xf] %v4_v0 }

// kernel: tile.9
= control target key start
LH: loop header
LB: loop body
LE: loop exit
PB: predicated region body
PF: predicated region fallthrough
CT: control target
= control target key end

     0   :  { %vm7_vm0 = vcmask 31744   ;;  %s37_s8 = smov 4   ;;  %s38_s9 = smov 8   ;;  %vm13_vm1 = vcmask 130144   ;;  %vm19_vm2 = vcmask 97344   ;;  %vm25_vm3 = vcmask 64544   ;;  %s55_s0 = inlined_call_operand.vmem [shape: f32[4,4], index: 0, kind: input, shape index: {}]   ;;  %s56_s1 = inlined_call_operand.vmem [shape: f32[1,16], index: 1, kind: output, shape index: {}]  }
   0x1   :  { %v4_v0 = vld [vmem:[%s55_s0] sm:$0xf]  ;;  %s36_s0 = smov 12  }
   0x2   :  { %5 = vst [vmem:[#allocation1] sm:$0xf] %v4_v0 }
   0x9   :  { %v10_v1 = vld [vmem:[#allocation1 + $0x3] sm:$0x1]   ;;  %v22_v2 = vld [vmem:[#allocation1 + $0x1] sm:$0x1]   ;;  %v6_v3 = vld [vmem:[#allocation1] sm:$0x1]  }
   0xa   :  { %11 = vrot.lane.b32.xlu0 %v10_v1, %s36_s0  ;;  %23 = vrot.lane.b32.xlu1 %v22_v2, %s37_s8  ;;  %v16_v4 = vld [vmem:[#allocation1 + $0x2] sm:$0x1]   ;;  %8 = vst.msk [vmem:[#allocation0] sm:$0x1] %vm7_vm0, %v6_v3  }
   0xe   :  { %17 = vrot.lane.b32.xlu0 %v16_v4, %s38_s9 }
  0x7c   :  { %v12_v5 = vpop.permute.xlu0 %11   ;;  %v24_v6 = vpop.permute.xlu1 %23  }
  0x7d   :  { %14 = vst.msk [vmem:[#allocation0] sm:$0x1] %vm13_vm1, %v12_v5  }
  0x80   :  { %v18_v7 = vpop.permute.xlu0 %17  }
  0x81   :  { %20 = vst.msk [vmem:[#allocation0] sm:$0x1] %vm19_vm2, %v18_v7  }
  0x82   :  { %26 = vst.msk [vmem:[#allocation0] sm:$0x1] %vm25_vm3, %v24_v6  }
  0x89   :  { %v30_v8 = vld [vmem:[#allocation0] sm:$0x1] }
  0x8a   :  { %32 = vst [vmem:[%s56_s1] sm:$0x1] %v30_v8 }

// kernel: base_rest_block_downsample.1
= control target key start
LH: loop header
LB: loop body
LE: loop exit
PB: predicated region body
PF: predicated region fallthrough
CT: control target
= control target key end

     0   :  { %13 = vsyncpa [#allocation4], 0  ;;  %s3166_s0 = inlined_call_operand.vmem [shape: f32[2,64,16], index: 0, kind: input, shape index: {}]   ;;  %s3167_s1 = inlined_call_operand.vmem [shape: f32[16,16], index: 1, kind: input, shape index: {}]   ;;  %s3168_s2 = inlined_call_operand.vmem [shape: f32[1,16], index: 2, kind: input, shape index: {}]   ;;  %s3169_s3 = inlined_call_operand.vmem [shape: f32[9,16,8], index: 3, kind: input, shape index: {}]   ;;  %s3170_s4 = inlined_call_operand.vmem [shape: f32[1,8], index: 4, kind: input, shape index: {}]   ;;  %s3171_s5 = inlined_call_operand.vmem [shape: f32[8,16], index: 5, kind: input, shape index: {}]   ;;  %s3172_s6 = inlined_call_operand.vmem [shape: f32[1,16], index: 6, kind: input, shape index: {}]   ;;  %s3173_s7 = inlined_call_operand.vmem [shape: f32[16,16], index: 7, kind: input, shape index: {}]   ;;  %s3174_s8 = inlined_call_operand.hbm [shape: f32[2,64,16], index: 8, kind: output, shape index: {}]  }
   0x1   :  { %15 = vsyncpa [#allocation4 + $0x1], 0  ;;  %s2729_s27 = smov 0   ;;  %s2731_s28 = smov 0  }
   0x2   :  { %s2733_s29 = smov 0   ;;  %s2735_s30 = smov 0  }
   0x3 LB: > { %s2750_s9 = sadd.s32 4294967295, %s2678_s30   ;;  %s2012_s10 = sadd.s32 4294967294, %s2678_s30   ;;  %s2678_s30 = sphi %s2735_s30, %s3180_s30   ;;  %s2674_s29 = sphi %s2733_s29, %s3179_s29   ;;  %s2670_s28 = sphi %s2731_s28, %s3178_s28   ;;  %s2666_s27 = sphi %s2729_s27, %s3177_s27  }
   0x4   : > { %s2754_s11 = sadd.s32 1, %s2678_s30   ;;  %s201_s12 = sadd.s32 1, %s2674_s29 }
   0x5   : > { %s198_s13 = ssub.s32 %s2678_s30, %s2754_s11  ;;  %p211_p0 = scmp.ne.s32.totalorder %s2674_s29, %s2670_s28 }
   0x6   : > { %p199_p1 = scmp.eq.s32.totalorder %s198_s13, 0  ;;  %p212_p2 = scmp.eq.s32.totalorder %s2750_s9, 1 }
   0x7   : > { %p217_p3 = scmp.ne.s32.totalorder %s2670_s28, %s2666_s27  ;;  %p218_p4 = scmp.eq.s32.totalorder %s2012_s10, 1 }
   0x8   : > { %s2765_s14 = scalar_select %p199_p1, %s2674_s29, %s201_s12  }
   0x9   : > { %p2767_p5 = por %p212_p2, %p211_p0  ;;  %p2771_p6 = por %p218_p4, %p217_p3 }
   0xa   : > { %p2015_p7 = scmp.ge.s32.totalorder %s2678_s30, 1  ;;  %p265_p8 = scmp.lt.s32.totalorder %s2678_s30, 3 }
   0xc   : > { %p266_p9 = pnand %p2015_p7, %p265_p8 }
   0xd   : > { %v312_v0 = vld [vmem:[%s3167_s1] sm:$0xff] (!%p266_p9)  ;;  %v313_v1 = vld [vmem:[%s3167_s1 + $0x8] sm:$0xff] (!%p266_p9)  ;;  %p299_p10 = scmp.lt.s32.totalorder (!%p266_p9), %s2750_s9, 1  ;;  %vm321_vm0 = vcmask (!%p266_p9), 130048   ;;  %vm460_vm1 = vcmask (!%p266_p9), 123904   ;;  %v2680_v11 = vmov (!%p266_p9), 0.0  }
   0xe   : > { %269 = sbr.rel (%p266_p9) target bundleno = 814 (0x32e), region = 52  ;;  %v2450_v2 = vpack.c.bf16 (!%p266_p9), %v313_v1, %v312_v0  ;;  %464 = vst.msk [vmem:[#allocation2 + $0x20] sm:$0xff] (!%p266_p9), %vm321_vm0, %v2680_v11  ;;  %459 = vst.msk [vmem:[#allocation2] sm:$0xff] (!%p266_p9), %vm321_vm0, %v2680_v11  ;;  %v2028_v12 = vld [vmem:[%s3169_s3 + $0x10] sm:$0xff] (!%p266_p9)  ;;  %v2029_v13 = vld [vmem:[%s3169_s3 + $0x18] sm:$0xff] (!%p266_p9)  ;;  %vm1675_vm2 = vcmask (!%p266_p9), 64512  }
   0xf   : > { %465 = vst.msk [vmem:[#allocation2 + $0x28] sm:$0x3] (!%p266_p9), %vm460_vm1, %v2680_v11  ;;  %461 = vst.msk [vmem:[#allocation2 + $0x8] sm:$0x3] (!%p266_p9), %vm460_vm1, %v2680_v11  ;;  %v2454_v14 = vpack.c.bf16 (!%p266_p9), %v2029_v13, %v2028_v12  ;;  %v2056_v15 = vld [vmem:[%s3169_s3 + $0x30] sm:$0xff] (!%p266_p9)  ;;  %v2057_v16 = vld [vmem:[%s3169_s3 + $0x38] sm:$0xff] (!%p266_p9) }
  0x10   : > { %2451 = vmatprep.subr.bf16.mxu0 (!%p266_p9), %v2450_v2  ;;  %462 = vst.msk [vmem:[#allocation2 + $0x10] sm:$0xff] (!%p266_p9), %vm321_vm0, %v2680_v11  ;;  %466 = vst.msk [vmem:[#allocation2 + $0x30] sm:$0xff] (!%p266_p9), %vm321_vm0, %v2680_v11  ;;  %v2466_v17 = vpack.c.bf16 (!%p266_p9), %v2057_v16, %v2056_v15  ;;  %v2066_v19 = vld [vmem:[%s3169_s3 + $0x40] sm:$0xff] (!%p266_p9)  ;;  %v2067_v20 = vld [vmem:[%s3169_s3 + $0x48] sm:$0xff] (!%p266_p9)  ;;  %s296_s20 = sand.u32 (!%p266_p9), 1, %s2670_s28   ;;  %s2681_s18 = smov (!%p266_p9), [#allocation3]  }
  0x11   : > { %2453 = vmatpush3.bf16.msra.mxu0 (!%p266_p9), %v2450_v2  ;;  %463 = vst.msk [vmem:[#allocation2 + $0x18] sm:$0x3] (!%p266_p9), %vm460_vm1, %v2680_v11  ;;  %467 = vst.msk [vmem:[#allocation2 + $0x38] sm:$0x3] (!%p266_p9), %vm460_vm1, %v2680_v11  ;;  %v2470_v21 = vpack.c.bf16 (!%p266_p9), %v2067_v20, %v2066_v19  ;;  %v497_v22 = vld [vmem:[%s3169_s3] sm:$0xff] (!%p266_p9)  ;;  %v498_v23 = vld [vmem:[%s3169_s3 + $0x8] sm:$0xff] (!%p266_p9) }
  0x12   : > { %468 = vst.msk [vmem:[#allocation2 + $0x40] sm:$0xff] (!%p266_p9), %vm321_vm0, %v2680_v11  ;;  %470 = vst.msk [vmem:[#allocation2 + $0x50] sm:$0xff] (!%p266_p9), %vm321_vm0, %v2680_v11  ;;  %2455 = vmatprep.subr.bf16.mxu0 (!%p266_p9), %v2454_v14  ;;  %2467 = vmatprep.subr.bf16.mxu1 (!%p266_p9), %v2466_v17  ;;  %v2458_v24 = vpack.c.bf16 (!%p266_p9), %v498_v23, %v497_v22  ;;  %v2019_v25 = vld [vmem:[%s3168_s2] ss:$0 sm:$0xff] (!%p266_p9)  ;;  %v2076_v41 = vld [vmem:[%s3169_s3 + $0x50] sm:$0xff] (!%p266_p9)  ;;  %s2016_s23 = sshll.u32 (!%p266_p9), %s296_s20, 6 }
  0x13   : > { %469 = vst.msk [vmem:[#allocation2 + $0x48] sm:$0x3] (!%p266_p9), %vm460_vm1, %v2680_v11  ;;  %471 = vst.msk [vmem:[#allocation2 + $0x58] sm:$0x3] (!%p266_p9), %vm460_vm1, %v2680_v11  ;;  %2469 = vmatpush3.bf16.msra.mxu1 (!%p266_p9), %v2466_v17  ;;  %v2077_v43 = vld [vmem:[%s3169_s3 + $0x58] sm:$0xff] (!%p266_p9)  ;;  %v2046_v44 = vld [vmem:[%s3169_s3 + $0x20] sm:$0xff] (!%p266_p9) }
  0x14   : > { %472 = vst.msk [vmem:[#allocation2 + $0x60] sm:$0xff] (!%p266_p9), %vm321_vm0, %v2680_v11  ;;  %474 = vst.msk [vmem:[#allocation2 + $0x70] sm:$0xff] (!%p266_p9), %vm321_vm0, %v2680_v11  ;;  %2471 = vmatprep.subr.bf16.mxu1 (!%p266_p9), %v2470_v21  ;;  %v2047_v45 = vld [vmem:[%s3169_s3 + $0x28] sm:$0xff] (!%p266_p9)  ;;  %v2474_v53 = vpack.c.bf16 (!%p266_p9), %v2077_v43, %v2076_v41  ;;  %v2086_v16 = vld [vmem:[%s3169_s3 + $0x60] sm:$0xff] (!%p266_p9)  ;;  %s298_s24 = scalar_lea.vmem (!%p266_p9), [#allocation3], %s2016_s23  ;;  %s2620_s19 = sshll.u32 (!%p266_p9), %s2681_s18, 4  ;;  %s2621_s19 = int_to_ptr.vmem [resolvable:$false] %s2620_s19 }
  0x15   : > { %s300_s21 = scalar_select %p299_p10, %s2750_s9, 1  ;;  %473 = vst.msk [vmem:[#allocation2 + $0x68] sm:$0x3] %vm460_vm1, %v2680_v11  ;;  %475 = vst.msk [vmem:[#allocation2 + $0x78] sm:$0x3] %vm460_vm1, %v2680_v11  ;;  %v2462_v54 = vpack.c.bf16 %v2047_v45, %v2046_v44  ;;  %v489_v12 = vld [vmem:[#allocation2] sm:$0xff] }
  0x16   : > { %476 = vst.msk [vmem:[#allocation2 + $0x80] sm:$0xff] %vm321_vm0, %v2680_v11  ;;  %v2850_v18 = vld [vmem:[#allocation2 + $0x1] sm:$0xff]  ;;  %v2097_v22 = vld [vmem:[%s3169_s3 + $0x78] sm:$0xff]  ;;  %s1950_s26 = sshll.u32 %s298_s24, 4  ;;  %s3119_s26 = int_to_ptr.vmem [resolvable:$true] %s1950_s26 }
  0x17   : > { %s2139_s22 = sshll.u32 %s300_s21, 6  ;;  %477 = vst.msk [vmem:[#allocation2 + $0x88] sm:$0x3] %vm460_vm1, %v2680_v11  ;;  %v2087_v17 = vld [vmem:[%s3169_s3 + $0x68] sm:$0xff]  ;;  %s2616_s17 = scalar_lea.vmem %s3119_s26, 1024 }
  0x18   : > { %s303_s25 = scalar_lea.vmem %s3166_s0, %s2139_s22  ;;  %v2478_v19 = vpack.c.bf16 %v2087_v17, %v2086_v16  ;;  %p2617_p11 = scmp.ne.s32.totalorder %s3119_s26, %s2616_s17 }
  0x19   : > { %v2788_v3 = vld [vmem:[%s303_s25] sm:$0xff]  ;;  %v2790_v4 = vld [vmem:[%s303_s25 + $0x8] sm:$0xff]  ;;  %v2792_v5 = vld [vmem:[%s303_s25 + $0x10] sm:$0xff]  ;;  %s2622_s21 = scalar_lea.vmem %s2621_s19, 2048  ;;  %p2623_p0 = scmp.lt.s32.totalorder %s3119_s26, %s2621_s19 }
  0x1a   : > { %2264 = vmatprep.mubr.msk.f32.mxu0 %vm321_vm0, %v2788_v3  ;;  %v2800_v6 = vld [vmem:[%s303_s25 + $0x18] sm:$0xff]  ;;  %v2802_v7 = vld [vmem:[%s303_s25 + $0x20] sm:$0xff]  ;;  %v2808_v8 = vld [vmem:[%s303_s25 + $0x28] sm:$0xff]  ;;  %p2618_p12 = pnand %p2617_p11, %p2767_p5  ;;  %p2624_p1 = scmp.lt.s32.totalorder %s2622_s21, %s2616_s17 }
  0x1b   : > { %2265 = vmatmul.mubr.msk.f32.vlgmr.msra.gmra.mrb[0].mxu0 %vm321_vm0, %v2790_v4  ;;  %v2810_v9 = vld [vmem:[%s303_s25 + $0x30] sm:$0xff]  ;;  %v2816_v10 = vld [vmem:[%s303_s25 + $0x38] sm:$0xff]  ;;  %s2140_s25 = sshll.u32 %s2750_s9, 10  ;;  %s3125_s9 = scalar_lea.sflag [#allocation4], %s296_s20 }
  0x1c   : > { %2267 = vmatprep.mubr.msk.f32.mxu0 %vm321_vm0, %v2792_v5  ;;  %2457 = vmatpush3.bf16.msra.mxu0 %v2454_v14  ;;  %s3117_s13 = scalar_lea.hbm %s3174_s8, %s2140_s25  ;;  %p2619_p13 = pneg %p2618_p12 }
  0x1d   : > { %2459 = vmatprep.subr.bf16.mxu0 %v2458_v24  ;;  %p2625_p2 = por %p2624_p1, %p2623_p0 }
  0x1f   : > { %2268 = vmatmul.mubr.msk.f32.gmra.mrb[2].mxu0 %vm321_vm0, %v2800_v6  ;;  %p2626_p3 = pnand %p2625_p2, %p2619_p13 }
  0x20   : > { %2270 = vmatprep.mubr.msk.f32.mxu0 %vm321_vm0, %v2802_v7 }
  0x23   : > { %2271 = vmatmul.mubr.msk.f32.gmra.mrb[4].mxu0 %vm321_vm0, %v2808_v8 }
  0x24   : > { %2273 = vmatprep.mubr.msk.f32.mxu0 %vm321_vm0, %v2810_v9 }
  0x27   : > { %2274 = vmatmul.mubr.msk.f32.gmra.mrb[6].mxu0 %vm321_vm0, %v2816_v10 }
  0x28   : > { %2280 = vmatprep.mubr.msk.f32.mxu0 %vm321_vm0, %v2850_v18 }
  0xee   : > { %v2266_v26 = vpop.f32.mrb[0].mxu0 }
  0xef   : > { %v418_v27 = vadd.f32 %v2266_v26, %v2019_v25  ;;  %v412_v28 = vpop.f32.mrb[1].mxu0  ;;  %v1667_v26 = vld [vmem:[%s3171_s5] sm:$0xff] }
  0xf0   : > { %v413_v29 = vadd.f32 %v2019_v25, %v412_v28  ;;  %v1806_v28 = vld [vmem:[%s3173_s7 + $0x8] sm:$0xff] }
  0xf1   : > { %v452_v30 = vmax.f32 %v418_v27, 0.0  ;;  %v1805_v27 = vld [vmem:[%s3173_s7] sm:$0xff] }
  0xf2   : > { %v451_v31 = vmax.f32 %v413_v29, 0.0  ;;  %v2269_v32 = vpop.f32.mrb[2].mxu0  ;;  %v2490_v29 = vpack.c.bf16 %v1806_v28, %v1805_v27 }
  0xf3   : > { %482 = vst.msk [vmem:[#allocation2 + $0x21] sm:$0xff] %vm321_vm0, %v452_v30  ;;  %v428_v33 = vadd.f32 %v2269_v32, %v2019_v25  ;;  %v422_v34 = vpop.f32.mrb[3].mxu0 }
  0xf4   : > { %481 = vst.msk [vmem:[#allocation2 + $0x11] sm:$0xff] %vm321_vm0, %v451_v31  ;;  %v423_v35 = vadd.f32 %v2019_v25, %v422_v34 }
  0xf5   : > { %v454_v36 = vmax.f32 %v428_v33, 0.0 }
  0xf6   : > { %v453_v37 = vmax.f32 %v423_v35, 0.0  ;;  %v2272_v38 = vpop.f32.mrb[4].mxu0 }
  0xf7   : > { %484 = vst.msk [vmem:[#allocation2 + $0x41] sm:$0xff] %vm321_vm0, %v454_v36  ;;  %v438_v39 = vadd.f32 %v2272_v38, %v2019_v25  ;;  %v432_v40 = vpop.f32.mrb[5].mxu0 }
  0xf8   : > { %483 = vst.msk [vmem:[#allocation2 + $0x31] sm:$0xff] %vm321_vm0, %v453_v37  ;;  %v433_v42 = vadd.f32 %v2019_v25, %v432_v40 }
  0xf9   : > { %v456_v46 = vmax.f32 %v438_v39, 0.0  ;;  %v2116_v39 = vld [vmem:[%s3170_s4] ss:$0 sm:$0xff] }
  0xfa   : > { %v455_v47 = vmax.f32 %v433_v42, 0.0  ;;  %v2275_v48 = vpop.f32.mrb[6].mxu0  ;;  %v2895_v56 = vld [vmem:[#allocation2 + $0x21] sm:$0xff] }
  0xfb   : > { %486 = vst.msk [vmem:[#allocation2 + $0x61] sm:$0xff] %vm321_vm0, %v456_v46  ;;  %v448_v49 = vadd.f32 %v2275_v48, %v2019_v25  ;;  %v442_v50 = vpop.f32.mrb[7].mxu0  ;;  %v2886_v51 = vld [vmem:[#allocation2 + $0x11] sm:$0xff]  ;;  %v2897_v57 = vld [vmem:[#allocation2 + $0x20] sm:$0xff] }
  0xfc   : > { %v2888_v52 = vld [vmem:[#allocation2 + $0x10] sm:$0xff]  ;;  %485 = vst.msk [vmem:[#allocation2 + $0x51] sm:$0xff] %vm321_vm0, %v455_v47  ;;  %v443_v55 = vadd.f32 %v2019_v25, %v442_v50  ;;  %2281 = vmatmul.mubr.msk.f32.vlgmr.msra.gmra.mrb[8].mxu0 %vm321_vm0, %v2886_v51 }
  0xfd   : > { %2328 = vmatprep.mubr.msk.f32.mxu1 %vm321_vm0, %v2888_v52  ;;  %v458_v58 = vmax.f32 %v448_v49, 0.0  ;;  %2283 = vmatprep.mubr.msk.f32.mxu0 %vm321_vm0, %v2895_v56 }
  0xfe   : > { %2329 = vmatmul.mubr.msk.f32.vlgmr.msra.gmra.mrb[0].mxu1 %vm321_vm0, %v2897_v57  ;;  %v457_v59 = vmax.f32 %v443_v55, 0.0  ;;  %2461 = vmatpush3.bf16.msra.mxu0 %v2458_v24  ;;  %v2913_v62 = vld [vmem:[#allocation2 + $0x41] sm:$0xff] }
  0xff   : > { %2473 = vmatpush3.bf16.msra.mxu1 %v2470_v21  ;;  %488 = vst.msk [vmem:[#allocation2 + $0x81] sm:$0xff] %vm321_vm0, %v458_v58  ;;  %v2904_v60 = vld [vmem:[#allocation2 + $0x31] sm:$0xff]  ;;  %2463 = vmatprep.subr.bf16.mxu0 %v2462_v54  ;;  %v2915_v63 = vld [vmem:[#allocation2 + $0x40] sm:$0xff]  ;;  %v2107_v24 = vld [vmem:[%s3169_s3 + $0x88] sm:$0xff] }
 0x100   : > { %v2906_v61 = vld [vmem:[#allocation2 + $0x30] sm:$0xff]  ;;  %2475 = vmatprep.subr.bf16.mxu1 %v2474_v53  ;;  %487 = vst.msk [vmem:[#allocation2 + $0x71] sm:$0xff] %vm321_vm0, %v457_v59  ;;  %2284 = vmatmul.mubr.msk.f32.gmra.mrb[10].mxu0 %vm321_vm0, %v2904_v60 }
 0x101   : > { %2331 = vmatprep.mubr.msk.f32.mxu1 %vm321_vm0, %v2906_v61  ;;  %2286 = vmatprep.mubr.msk.f32.mxu0 %vm321_vm0, %v2913_v62  ;;  %v2096_v21 = vld [vmem:[%s3169_s3 + $0x70] sm:$0xff] }
 0x102   : > { %2332 = vmatmul.mubr.msk.f32.gmra.mrb[2].mxu1 %vm321_vm0, %v2915_v63  ;;  %v2929_v2 = vld [vmem:[#allocation2 + $0x61] sm:$0xff]  ;;  %v2482_v23 = vpack.c.bf16 %v2097_v22, %v2096_v21 }
 0x103   : > { %v2921_v0 = vld [vmem:[#allocation2 + $0x51] sm:$0xff]  ;;  %v2931_v11 = vld [vmem:[#allocation2 + $0x60] sm:$0xff] }
 0x104   : > { %v2923_v1 = vld [vmem:[#allocation2 + $0x50] sm:$0xff]  ;;  %2287 = vmatmul.mubr.msk.f32.gmra.mrb[12].mxu0 %vm321_vm0, %v2921_v0 }
 0x105   : > { %2334 = vmatprep.mubr.msk.f32.mxu1 %vm321_vm0, %v2923_v1  ;;  %2289 = vmatprep.mubr.msk.f32.mxu0 %vm321_vm0, %v2929_v2 }
 0x106   : > { %2335 = vmatmul.mubr.msk.f32.gmra.mrb[4].mxu1 %vm321_vm0, %v2931_v11  ;;  %v891_v15 = vld [vmem:[#allocation2 + $0x80] sm:$0xff] }
 0x107   : > { %v2937_v13 = vld [vmem:[#allocation2 + $0x71] sm:$0xff]  ;;  %v1039_v20 = vld [vmem:[#allocation2 + $0x81] sm:$0xff] }
 0x108   : > { %v890_v14 = vld [vmem:[#allocation2 + $0x70] sm:$0xff]  ;;  %2290 = vmatmul.mubr.msk.f32.gmra.mrb[14].mxu0 %vm321_vm0, %v2937_v13 }
 0x109   : > { %2337 = vmatprep.mubr.msk.f32.mxu1 %vm321_vm0, %v890_v14  ;;  %2296 = vmatprep.mubr.msk.f32.mxu0 %vm321_vm0, %v489_v12 }
 0x10a   : > { %2338 = vmatmul.mubr.msk.f32.gmra.mrb[6].mxu1 %vm321_vm0, %v891_v15 }
 0x10b   : > { %2344 = vmatprep.mubr.msk.f32.mxu1 %vm321_vm0, %v2886_v51 }
 0x10c   : > { %2297 = vmatmul.mubr.msk.f32.vlgmr.msra.gmra.mrb[8].mxu0 %vm321_vm0, %v2888_v52 }
 0x10d   : > { %2299 = vmatprep.mubr.msk.f32.mxu0 %vm321_vm0, %v2897_v57  ;;  %2465 = vmatpush3.bf16.msra.mxu0 %v2462_v54 }
 0x10e   : > { %2345 = vmatmul.mubr.msk.f32.vlgmr.msra.gmra.mrb[0].mxu1 %vm321_vm0, %v2895_v56  ;;  %2420 = vmatprep.subr.mxu0 %v1667_v26 }
 0x10f   : > { %2477 = vmatpush3.bf16.msra.mxu1 %v2474_v53  ;;  %2347 = vmatprep.mubr.msk.f32.mxu1 %vm321_vm0, %v2904_v60 }
 0x110   : > { %2479 = vmatprep.subr.bf16.mxu1 %v2478_v19  ;;  %2300 = vmatmul.mubr.msk.f32.gmra.mrb[10].mxu0 %vm321_vm0, %v2906_v61 }
 0x111   : > { %2302 = vmatprep.mubr.msk.f32.mxu0 %vm321_vm0, %v2915_v63 }
 0x112   : > { %2348 = vmatmul.mubr.msk.f32.gmra.mrb[2].mxu1 %vm321_vm0, %v2913_v62 }
 0x113   : > { %2350 = vmatprep.mubr.msk.f32.mxu1 %vm321_vm0, %v2921_v0 }
 0x114   : > { %2303 = vmatmul.mubr.msk.f32.gmra.mrb[12].mxu0 %vm321_vm0, %v2923_v1 }
 0x115   : > { %2305 = vmatprep.mubr.msk.f32.mxu0 %vm321_vm0, %v2931_v11 }
 0x116   : > { %2351 = vmatmul.mubr.msk.f32.gmra.mrb[4].mxu1 %vm321_vm0, %v2929_v2 }
 0x117   : > { %2353 = vmatprep.mubr.msk.f32.mxu1 %vm321_vm0, %v2937_v13 }
 0x118   : > { %2306 = vmatmul.mubr.msk.f32.gmra.mrb[14].mxu0 %vm321_vm0, %v890_v14 }
 0x119   : > { %2312 = vmatprep.mubr.msk.f32.mxu0 %vm321_vm0, %v2850_v18  ;;  %v2106_v18 = vld [vmem:[%s3169_s3 + $0x80] sm:$0xff] }
 0x11a   : > { %2354 = vmatmul.mubr.msk.f32.gmra.mrb[6].mxu1 %vm321_vm0, %v1039_v20  ;;  %v2486_v25 = vpack.c.bf16 %v2107_v24, %v2106_v18 }
 0x11b   : > { %2360 = vmatprep.mubr.msk.f32.mxu1 %vm321_vm0, %v2886_v51 }
 0x11c   : > { %2313 = vmatmul.mubr.msk.f32.vlgmr.msra.gmra.mrb[8].mxu0 %vm321_vm0, %v2886_v51 }
 0x11d   : > { %2315 = vmatprep.mubr.msk.f32.mxu0 %vm321_vm0, %v2895_v56  ;;  %2421 = vmatpush3.msra.mxu0 %v1667_v26 }
 0x11e   : > { %2361 = vmatmul.mubr.msk.f32.vlgmr.msra.gmra.mrb[0].mxu1 %vm321_vm0, %v2895_v56  ;;  %2491 = vmatprep.subr.bf16.mxu0 %v2490_v29 }
 0x11f   : > { %2481 = vmatpush3.bf16.msra.mxu1 %v2478_v19  ;;  %2363 = vmatprep.mubr.msk.f32.mxu1 %vm321_vm0, %v2904_v60 }
 0x120   : > { %2483 = vmatprep.subr.bf16.mxu1 %v2482_v23  ;;  %2316 = vmatmul.mubr.msk.f32.gmra.mrb[10].mxu0 %vm321_vm0, %v2904_v60 }
 0x121   : > { %2318 = vmatprep.mubr.msk.f32.mxu0 %vm321_vm0, %v2913_v62 }
 0x122   : > { %2364 = vmatmul.mubr.msk.f32.gmra.mrb[2].mxu1 %vm321_vm0, %v2913_v62 }
 0x123   : > { %2366 = vmatprep.mubr.msk.f32.mxu1 %vm321_vm0, %v2921_v0 }
 0x124   : > { %2319 = vmatmul.mubr.msk.f32.gmra.mrb[12].mxu0 %vm321_vm0, %v2921_v0 }
 0x125   : > { %2321 = vmatprep.mubr.msk.f32.mxu0 %vm321_vm0, %v2929_v2 }
 0x126   : > { %2367 = vmatmul.mubr.msk.f32.gmra.mrb[4].mxu1 %vm321_vm0, %v2929_v2 }
 0x127   : > { %2369 = vmatprep.mubr.msk.f32.mxu1 %vm321_vm0, %v2937_v13 }
 0x128   : > { %2322 = vmatmul.mubr.msk.f32.gmra.mrb[14].mxu0 %vm321_vm0, %v2937_v13 }
 0x12a   : > { %2370 = vmatmul.mubr.msk.f32.gmra.mrb[6].mxu1 %vm321_vm0, %v1039_v20 }
 0x12b   : > { %2376 = vmatprep.mubr.msk.f32.mxu1 %vm321_vm0, %v2888_v52 }
 0x12e   : > { %2377 = vmatmul.mubr.msk.f32.vlgmr.msra.gmra.mrb[0].mxu1 %vm321_vm0, %v2897_v57 }
 0x12f   : > { %2485 = vmatpush3.bf16.msra.mxu1 %v2482_v23  ;;  %2379 = vmatprep.mubr.msk.f32.mxu1 %vm321_vm0, %v2906_v61 }
 0x130   : > { %2487 = vmatprep.subr.bf16.mxu1 %v2486_v25 }
 0x132   : > { %2380 = vmatmul.mubr.msk.f32.gmra.mrb[2].mxu1 %vm321_vm0, %v2915_v63 }
 0x133   : > { %2382 = vmatprep.mubr.msk.f32.mxu1 %vm321_vm0, %v2923_v1 }
 0x136   : > { %2383 = vmatmul.mubr.msk.f32.gmra.mrb[4].mxu1 %vm321_vm0, %v2931_v11 }
 0x137   : > { %2385 = vmatprep.mubr.msk.f32.mxu1 %vm321_vm0, %v890_v14 }
 0x13a   : > { %2386 = vmatmul.mubr.msk.f32.gmra.mrb[6].mxu1 %vm321_vm0, %v891_v15 }
 0x13b   : > { %2392 = vmatprep.mubr.msk.f32.mxu1 %vm321_vm0, %v2886_v51 }
 0x13e   : > { %2393 = vmatmul.mubr.msk.f32.vlgmr.msra.gmra.mrb[0].mxu1 %vm321_vm0, %v2895_v56 }
 0x13f   : > { %2489 = vmatpush3.bf16.msra.mxu1 %v2486_v25  ;;  %2395 = vmatprep.mubr.msk.f32.mxu1 %vm321_vm0, %v2904_v60 }
 0x142   : > { %2396 = vmatmul.mubr.msk.f32.gmra.mrb[2].mxu1 %vm321_vm0, %v2913_v62 }
 0x143   : > { %2398 = vmatprep.mubr.msk.f32.mxu1 %vm321_vm0, %v2921_v0 }
 0x146   : > { %2399 = vmatmul.mubr.msk.f32.gmra.mrb[4].mxu1 %vm321_vm0, %v2929_v2 }
 0x147   : > { %2401 = vmatprep.mubr.msk.f32.mxu1 %vm321_vm0, %v2937_v13 }
 0x14a   : > { %2402 = vmatmul.mubr.msk.f32.gmra.mrb[6].mxu1 %vm321_vm0, %v1039_v20 }
 0x14b   : > { %2408 = vmatprep.mubr.msk.f32.mxu1 %vm321_vm0, %v2886_v51 }
 0x14e   : > { %2409 = vmatmul.mubr.msk.f32.vlgmr.msra.gmra.mrb[0].mxu1 %vm321_vm0, %v2895_v56 }
 0x14f   : > { %2411 = vmatprep.mubr.msk.f32.mxu1 %vm321_vm0, %v2904_v60 }
 0x152   : > { %2412 = vmatmul.mubr.msk.f32.gmra.mrb[2].mxu1 %vm321_vm0, %v2913_v62 }
 0x153   : > { %2414 = vmatprep.mubr.msk.f32.mxu1 %vm321_vm0, %v2921_v0 }
 0x156   : > { %2415 = vmatmul.mubr.msk.f32.gmra.mrb[4].mxu1 %vm321_vm0, %v2929_v2 }
 0x157   : > { %2417 = vmatprep.mubr.msk.f32.mxu1 %vm321_vm0, %v2937_v13 }
 0x15a   : > { %2418 = vmatmul.mubr.msk.f32.gmra.mrb[6].mxu1 %vm321_vm0, %v1039_v20 }
 0x1ef   : > { %v2314_v30 = vpop.f32.mrb[8].mxu0 }
 0x1f0   : > { %v837_v31 = vpop.f32.mrb[9].mxu0 }
 0x1f3   : > { %v2317_v32 = vpop.f32.mrb[10].mxu0 }
 0x1f4   : > { %v847_v33 = vpop.f32.mrb[11].mxu0 }
 0x1f7   : > { %v2320_v34 = vpop.f32.mrb[12].mxu0 }
 0x1f8   : > { %v857_v35 = vpop.f32.mrb[13].mxu0 }
 0x1fb   : > { %v2323_v36 = vpop.f32.mrb[14].mxu0 }
 0x1fc   : > { %v867_v37 = vpop.f32.mrb[15].mxu0 }
 0x221   : > { %v2410_v38 = vpop.f32.mrb[0].mxu1 }
 0x222   : > { %v2494_v40 = vadd.f32 %v2410_v38, %v2314_v30  ;;  %v1597_v41 = vpop.f32.mrb[1].mxu1 }
 0x223   : > { %v2495_v42 = vadd.f32 %v1597_v41, %v837_v31 }
 0x224   : > { %v1652_v43 = vadd.f32 %v2494_v40, %v2116_v39 }
 0x225   : > { %v1651_v44 = vadd.f32 %v2495_v42, %v2116_v39  ;;  %v2413_v45 = vpop.f32.mrb[2].mxu1 }
 0x226   : > { %v2496_v46 = vadd.f32 %v2413_v45, %v2317_v32  ;;  %v1607_v47 = vpop.f32.mrb[3].mxu1  ;;  %v1660_v50 = vmax.f32 %v1652_v43, 0.0 }
 0x227   : > { %v1659_v48 = vmax.f32 %v1651_v44, 0.0  ;;  %v2497_v49 = vadd.f32 %v1607_v47, %v847_v33 }
 0x228   : > { %v1654_v51 = vadd.f32 %v2496_v46, %v2116_v39 }
 0x229   : > { %v1653_v52 = vadd.f32 %v2497_v49, %v2116_v39  ;;  %v2416_v53 = vpop.f32.mrb[4].mxu1  ;;  %2422 = vmatprep.mubr.msk.f32.mxu0 %vm1675_vm2, %v1659_v48 }
 0x22a   : > { %v2498_v54 = vadd.f32 %v2416_v53, %v2320_v34  ;;  %v1617_v55 = vpop.f32.mrb[5].mxu1  ;;  %2423 = vmatmul.mubr.msk.f32.vlgmr.msra.gmra.mrb[16].mxu0 %vm1675_vm2, %v1660_v50  ;;  %v1662_v58 = vmax.f32 %v1654_v51, 0.0 }
 0x22b   : > { %v1661_v56 = vmax.f32 %v1653_v52, 0.0  ;;  %v2499_v57 = vadd.f32 %v1617_v55, %v857_v35  ;;  %2493 = vmatpush3.bf16.msra.mxu0 %v2490_v29 }
 0x22c   : > { %v1656_v59 = vadd.f32 %v2498_v54, %v2116_v39 }
 0x22d   : > { %v1655_v60 = vadd.f32 %v2499_v57, %v2116_v39  ;;  %v2419_v61 = vpop.f32.mrb[6].mxu1  ;;  %2425 = vmatprep.mubr.msk.f32.mxu0 %vm1675_vm2, %v1661_v56 }
 0x22e   : > { %v2500_v62 = vadd.f32 %v2419_v61, %v2323_v36  ;;  %v1627_v63 = vpop.f32.mrb[7].mxu1  ;;  %2426 = vmatmul.mubr.msk.f32.gmra.mrb[18].mxu0 %vm1675_vm2, %v1662_v58  ;;  %v1664_v2 = vmax.f32 %v1656_v59, 0.0 }
 0x22f   : > { %v1663_v0 = vmax.f32 %v1655_v60, 0.0  ;;  %v2501_v1 = vadd.f32 %v1627_v63, %v867_v37 }
 0x230   : > { %v1658_v11 = vadd.f32 %v2500_v62, %v2116_v39 }
 0x231   : > { %v1657_v12 = vadd.f32 %v2501_v1, %v2116_v39  ;;  %2428 = vmatprep.mubr.msk.f32.mxu0 %vm1675_vm2, %v1663_v0 }
 0x232   : > { %2429 = vmatmul.mubr.msk.f32.gmra.mrb[20].mxu0 %vm1675_vm2, %v1664_v2  ;;  %v1666_v14 = vmax.f32 %v1658_v11, 0.0 }
 0x233   : > { %v1665_v13 = vmax.f32 %v1657_v12, 0.0 }
 0x235   : > { %2431 = vmatprep.mubr.msk.f32.mxu0 %vm1675_vm2, %v1665_v13 }
 0x236   : > { %2432 = vmatmul.mubr.msk.f32.gmra.mrb[22].mxu0 %vm1675_vm2, %v1666_v14 }
 0x237   : > { %2438 = vmatprep.mubr.msk.f32.mxu0 %vm321_vm0, %v2788_v3  ;;  %v2117_v3 = vld [vmem:[%s3172_s6] ss:$0 sm:$0xff] }
 0x23a   : > { %2439 = vmatmul.mubr.msk.f32.vlgmr.msra.gmra.mrb[16].mxu0 %vm321_vm0, %v2790_v4 }
 0x23b   : > { %2441 = vmatprep.mubr.msk.f32.mxu0 %vm321_vm0, %v2792_v5 }
 0x23e   : > { %2442 = vmatmul.mubr.msk.f32.gmra.mrb[18].mxu0 %vm321_vm0, %v2800_v6 }
 0x23f   : > { %2444 = vmatprep.mubr.msk.f32.mxu0 %vm321_vm0, %v2802_v7 }
 0x242   : > { %2445 = vmatmul.mubr.msk.f32.gmra.mrb[20].mxu0 %vm321_vm0, %v2808_v8 }
 0x243   : > { %2447 = vmatprep.mubr.msk.f32.mxu0 %vm321_vm0, %v2810_v9 }
 0x246   : > { %2448 = vmatmul.mubr.msk.f32.gmra.mrb[22].mxu0 %vm321_vm0, %v2816_v10 }
 0x30d   : > { %v2440_v4 = vpop.f32.mrb[16].mxu0 }
 0x30e   : > { %v2502_v5 = vadd.f32 %v2440_v4, %v2117_v3  ;;  %v1873_v6 = vpop.f32.mrb[17].mxu0 }
 0x30f   : > { %v2503_v7 = vadd.f32 %v2117_v3, %v1873_v6 }
 0x310   : > { %v1921_v15 = vmax.f32 %v2502_v5, 0.0 }
 0x311   : > { %v1920_v16 = vmax.f32 %v2503_v7, 0.0  ;;  %v2443_v8 = vpop.f32.mrb[18].mxu0 }
 0x312   : > { %1929 = vst.msk [vmem:[%s298_s24 + $0x8] sm:$0xff] %vm321_vm0, %v1921_v15  ;;  %v2504_v9 = vadd.f32 %v2443_v8, %v2117_v3  ;;  %v1883_v10 = vpop.f32.mrb[19].mxu0 }
 0x313   : > { %1928 = vst.msk [vmem:[%s298_s24] sm:$0xff] %vm321_vm0, %v1920_v16  ;;  %v2505_v17 = vadd.f32 %v2117_v3, %v1883_v10 }
 0x314   : > { %v1923_v19 = vmax.f32 %v2504_v9, 0.0 }
 0x315   : > { %v1922_v20 = vmax.f32 %v2505_v17, 0.0  ;;  %v2446_v21 = vpop.f32.mrb[20].mxu0 }
 0x316   : > { %1931 = vst.msk [vmem:[%s298_s24 + $0x18] sm:$0xff] %vm321_vm0, %v1923_v19  ;;  %v2506_v22 = vadd.f32 %v2446_v21, %v2117_v3  ;;  %v1893_v23 = vpop.f32.mrb[21].mxu0 }
 0x317   : > { %1930 = vst.msk [vmem:[%s298_s24 + $0x10] sm:$0xff] %vm321_vm0, %v1922_v20  ;;  %v2507_v18 = vadd.f32 %v2117_v3, %v1893_v23 }
 0x318   : > { %v1925_v24 = vmax.f32 %v2506_v22, 0.0 }
 0x319   : > { %v1924_v25 = vmax.f32 %v2507_v18, 0.0  ;;  %v2449_v26 = vpop.f32.mrb[22].mxu0 }
 0x31a   : > { %1933 = vst.msk [vmem:[%s298_s24 + $0x28] sm:$0xff] %vm321_vm0, %v1925_v24  ;;  %v2508_v27 = vadd.f32 %v2449_v26, %v2117_v3  ;;  %v1903_v28 = vpop.f32.mrb[23].mxu0 }
 0x31b   : > { %1932 = vst.msk [vmem:[%s298_s24 + $0x20] sm:$0xff] %vm321_vm0, %v1924_v25  ;;  %v2509_v29 = vadd.f32 %v2117_v3, %v1903_v28 }
 0x31c   : > { %v1927_v30 = vmax.f32 %v2508_v27, 0.0 }
 0x31d   : > { %v1926_v31 = vmax.f32 %v2509_v29, 0.0 }
 0x31e   : > { %1935 = vst.msk [vmem:[%s298_s24 + $0x38] sm:$0xff] %vm321_vm0, %v1927_v30 }
 0x31f   : > { %1934 = vst.msk [vmem:[%s298_s24 + $0x30] sm:$0xff] %vm321_vm0, %v1926_v31 }
 0x320   : > { %2629 = shalt.err (!%p2626_p3)
}
 0x321   : > { %s2630_s20 = scalar_lea.hbm %s3117_s13, 1024  ;;  %s2634_s24 = scalar_lea.hbm %s3174_s8, 2048 }
 0x322   : > { %p2631_p4 = scmp.ne.s32.totalorder %s3117_s13, %s2630_s20  ;;  %p2635_p9 = scmp.lt.u32.totalorder %s3117_s13, %s3174_s8 }
 0x323   : > { %p2636_p10 = scmp.lt.u32.totalorder %s2634_s24, %s2630_s20  ;;  %p2638_p12 = scmp.lt.u32.totalorder %s2630_s20, %s3117_s13 }
 0x324   : > { %p2632_p7 = pnand %p2631_p4, %p2767_p5 }
 0x325   : > { %p2637_p11 = por %p2636_p10, %p2635_p9 }
 0x326   : > { %p2633_p8 = pneg %p2632_p7 }
 0x327   : > { %p2639_p13 = por %p2638_p12, %p2637_p11 }
 0x329   : > { %p2640_p0 = pnand %p2639_p13, %p2633_p8 }
 0x32b   : > { %2643 = shalt.err (!%p2640_p0)
}
 0x32c   : > { %s2682_s12 = smov 128   ;;  %s2683_s17 = smov 8  }
 0x32d   : > { %2574 = dma.vmem_to_hbm [thread:$0]  (%p2767_p5), %s3119_s26, 1024, %s3117_s13, %s3125_s9, %s2682_s12, %s2682_s12, %s2683_s17  }
 0x32e PF: > { %p2580_p1 = scmp.ge.s32.totalorder %s2678_s30, 2  ;;  %s1965_s18 = sand.u32 1, %s2666_s27  }
 0x32f   : > { %s1966_s19 = scalar_lea.sflag [#allocation4], %s1965_s18 }
 0x330   : > { %p2577_p2 = pnand %p2580_p1, %p2771_p6 }
 0x332   : > { %2661 = dma.done.wait (!%p2577_p2), %s1966_s19, 1024  }
 0x333   : > { %2663 = vsyncadd (!%p2577_p2), %s1966_s19, 4294966272  ;;  %p18_p3 = scmp.ge.s32.totalorder %s2754_s11, 4   ;;  %s3177_s27 = smov %s2670_s28 }
 0x334   : > { %s3178_s28 = smov %s2674_s29  ;;  %s3179_s29 = smov %s2765_s14 }
 0x335   : > { %s3180_s30 = smov %s2754_s11  ;;  %20 = sbr.rel (!%p18_p3) target bundleno = 3 (0x3), region = 96 }
 0x33c   :  { %1971 = vsyncpa [#allocation4], 1 }
 0x33d   :  { %1973 = vsyncpa [#allocation4 + $0x1], 1 }

</bundles_post_ra>
